<compile_context>
chip_gen: v5e
topology: v5e:2x2
jax: 0.10.0
libtpu: 0.0.40
codegen_flags: <defaults>
</compile_context>

<pallas_src>
import jax
import jax.numpy as jnp
from jax.experimental import pallas as pl
from jax.experimental.pallas import tpu as pltpu

IN_F, H1, H2, OUT_F = 8, 6, 5, 1
LANE = 128
PACK = LANE // IN_F            # 16 samples packed per 128-lane row
MAX_TILE_ROWS = 4096           # 4096 rows * 512 B = 2 MiB of x per grid step


def _round_up(x, m):
    return ((x + m - 1) // m) * m


def _num_tensorcores():
    """Best-effort TensorCores-per-device detection (for megacore sharding)."""
    try:
        kind = jax.devices()[0].device_kind.lower()
    except Exception:
        return 1
    return 2 if any(t in kind for t in ("v4", "v5p", "7x", "v7", "tpu7")) else 1


def _pick_tiling(r_total, num_tc):
    """Rows-per-block and grid size for the packed (r_total, 128) input."""
    if r_total <= MAX_TILE_ROWS and (num_tc == 1 or r_total < 2048):
        return r_total, 1                               # one exact block
    steps = max(pl.cdiv(r_total, MAX_TILE_ROWS), num_tc)
    if num_tc > 1:
        steps = _round_up(steps, num_tc)                # even split across cores
    tile_rows = _round_up(pl.cdiv(r_total, steps), 8)   # sublane-aligned
    return tile_rows, pl.cdiv(r_total, tile_rows)


def mlp_kernel(x_ref, w1_ref, b1_ref, w2_ref, b2_ref, w3_ref, b3_ref, o_ref):
    # x_ref: (TR, 128) f32 -- each 128-lane row holds 16 samples x 8 features.
    x = x_ref[...]
    h1 = jnp.dot(x, w1_ref[...], preferred_element_type=jnp.float32) + b1_ref[...]
    h2 = jax.nn.sigmoid(
        jnp.dot(h1, w2_ref[...], preferred_element_type=jnp.float32) + b2_ref[...])
    z = jnp.dot(h2, w3_ref[...], preferred_element_type=jnp.float32) + b3_ref[...]
    o_ref[...] = jnp.maximum(z, 0.0).astype(o_ref.dtype)   # (TR, 16)


def _expand_layer(w, b):
    """(out,in) weight, (out,1) bias -> lane-packed block-diagonal versions."""
    w_big = jnp.kron(jnp.eye(PACK, dtype=w.dtype), w.T)    # (PACK*in, PACK*out)
    b_big = jnp.tile(b.reshape(1, -1), (1, PACK))           # (1, PACK*out)
    return w_big, b_big


def widedeep_forward(x, params):
    """x: (B, 8) float32 -> (B, 1) float32 (matches PyTorch Model.forward)."""
    B, F = x.shape
    assert F == IN_F
    # Pad only to a multiple of PACK=16 (<= 15 rows; no-op when already aligned).
    b_pad = _round_up(B, PACK)
    if b_pad != B:
        x = jnp.pad(x, ((0, b_pad - B), (0, 0)))
    r_total = b_pad // PACK
    x_packed = x.reshape(r_total, PACK * IN_F)               # free contiguous re-view

    w1b, b1b = _expand_layer(params["w1"], params["b1"])     # (128, 96), (1, 96)
    w2b, b2b = _expand_layer(params["w2"], params["b2"])     # (96, 80),  (1, 80)
    w3b, b3b = _expand_layer(params["w3"], params["b3"])     # (80, 16),  (1, 16)

    tile_rows, grid_n = _pick_tiling(r_total, _num_tensorcores())

    resident = lambda a: pl.BlockSpec(a.shape, lambda i: (0, 0))   # DMA'd once
    grid_spec = pltpu.PrefetchScalarGridSpec(
        num_scalar_prefetch=0,
        grid=(grid_n,),
        in_specs=[
            pl.BlockSpec((tile_rows, PACK * IN_F), lambda i: (i, 0)),
            resident(w1b), resident(b1b),
            resident(w2b), resident(b2b),
            resident(w3b), resident(b3b),
        ],
        out_specs=pl.BlockSpec((tile_rows, PACK * OUT_F), lambda i: (i, 0)),
    )
    out_packed = pl.pallas_call(
        mlp_kernel,
        out_shape=jax.ShapeDtypeStruct((r_total, PACK * OUT_F), jnp.float32),
        grid_spec=grid_spec,
        compiler_params=pltpu.CompilerParams(dimension_semantics=("parallel",)),
    )(x_packed, w1b, b1b, w2b, b2b, w3b, b3b)

    return out_packed.reshape(b_pad, OUT_F)[:B]              # free reshape + slice


def init_params(key):
    """Deterministic init mimicking torch.nn.Linear (uniform +-1/sqrt(fan_in)).

    Weights are (out_features, in_features) like PyTorch; biases (out, 1)."""
    ks = jax.random.split(key, 6)

    def linear(kw, kb, fan_in, fan_out):
        bound = 1.0 / jnp.sqrt(jnp.float32(fan_in))
        w = jax.random.uniform(kw, (fan_out, fan_in), jnp.float32, -bound, bound)
        b = jax.random.uniform(kb, (fan_out, 1), jnp.float32, -bound, bound)
        return w, b

    w1, b1 = linear(ks[0], ks[1], IN_F, H1)
    w2, b2 = linear(ks[2], ks[3], H1, H2)
    w3, b3 = linear(ks[4], ks[5], H2, OUT_F)
    return dict(w1=w1, b1=b1, w2=w2, b2=b2, w3=w3, b3=b3)


def reference_forward(x, p):
    h1 = x @ p["w1"].T + p["b1"].T
    h2 = jax.nn.sigmoid(h1 @ p["w2"].T + p["b2"].T)
    return jnp.maximum(h2 @ p["w3"].T + p["b3"].T, 0.0)


if __name__ == "__main__":
    key = jax.random.PRNGKey(0)
    kx, kp = jax.random.split(key)
    B = 300                     # deliberately NOT a multiple of 16 / the tile size
    x = jax.random.normal(kx, (B, IN_F), jnp.float32)
    params = init_params(kp)

    fwd = jax.jit(widedeep_forward)
    y = jax.block_until_ready(fwd(x, params))
    y_ref = reference_forward(x, params)

    assert y.shape == (B, OUT_F)
    assert jnp.allclose(y, y_ref, atol=1e-5, rtol=1e-5), "mismatch vs JAX reference"
    print("KERNEL_OK")
</pallas_src>

<mosaic_0001>
module attributes {stable_mosaic.version = 11 : i64} {
  func.func @mlp_kernel(%arg0: i32, %arg1: memref<19x128xf32, #tpu.memory_space<vmem>>, %arg2: memref<128x96xf32, #tpu.memory_space<vmem>>, %arg3: memref<1x96xf32, #tpu.memory_space<vmem>>, %arg4: memref<96x80xf32, #tpu.memory_space<vmem>>, %arg5: memref<1x80xf32, #tpu.memory_space<vmem>>, %arg6: memref<80x16xf32, #tpu.memory_space<vmem>>, %arg7: memref<1x16xf32, #tpu.memory_space<vmem>>, %arg8: memref<19x16xf32, #tpu.memory_space<vmem>>) attributes {dimension_semantics = [#tpu.dimension_semantics<parallel>], iteration_bounds = array<i64: 1>, scalar_prefetch = 0 : i64, scratch_operands = 0 : i64, tpu.core_type = #tpu.core_type<tc>, window_params = [{transform_indices = @transform_0, window_bounds = array<i64: 19, 128>}, {pipeline_mode = #tpu.pipeline_mode<synchronous>, transform_indices = @transform_1, window_bounds = array<i64: 128, 96>}, {pipeline_mode = #tpu.pipeline_mode<synchronous>, transform_indices = @transform_2, window_bounds = array<i64: 1, 96>}, {pipeline_mode = #tpu.pipeline_mode<synchronous>, transform_indices = @transform_3, window_bounds = array<i64: 96, 80>}, {pipeline_mode = #tpu.pipeline_mode<synchronous>, transform_indices = @transform_4, window_bounds = array<i64: 1, 80>}, {pipeline_mode = #tpu.pipeline_mode<synchronous>, transform_indices = @transform_5, window_bounds = array<i64: 80, 16>}, {pipeline_mode = #tpu.pipeline_mode<synchronous>, transform_indices = @transform_6, window_bounds = array<i64: 1, 16>}, {transform_indices = @transform_7, window_bounds = array<i64: 19, 16>}]} {
    %c0 = arith.constant 0 : index
    %c0_0 = arith.constant 0 : index
    %0 = vector.load %arg1[%c0, %c0_0] : memref<19x128xf32, #tpu.memory_space<vmem>>, vector<19x128xf32>
    %c0_1 = arith.constant 0 : index
    %c0_2 = arith.constant 0 : index
    %1 = vector.load %arg2[%c0_1, %c0_2] : memref<128x96xf32, #tpu.memory_space<vmem>>, vector<128x96xf32>
    %cst = arith.constant dense<0.000000e+00> : vector<19x96xf32>
    %2 = tpu.matmul %0, %1, %cst {dimension_numbers = #tpu.dot_dimension_numbers<[1], [0], [0], [1], [0, 0, 1, 1], [], []>} : vector<19x128xf32>, vector<128x96xf32>, vector<19x96xf32> -> vector<19x96xf32>
    %c0_3 = arith.constant 0 : index
    %c0_4 = arith.constant 0 : index
    %3 = vector.load %arg3[%c0_3, %c0_4] : memref<1x96xf32, #tpu.memory_space<vmem>>, vector<1x96xf32>
    %4 = vector.broadcast %3 : vector<1x96xf32> to vector<19x96xf32>
    %5 = arith.addf %2, %4 : vector<19x96xf32>
    %c0_5 = arith.constant 0 : index
    %c0_6 = arith.constant 0 : index
    %6 = vector.load %arg4[%c0_5, %c0_6] : memref<96x80xf32, #tpu.memory_space<vmem>>, vector<96x80xf32>
    %cst_7 = arith.constant dense<0.000000e+00> : vector<19x80xf32>
    %7 = tpu.matmul %5, %6, %cst_7 {dimension_numbers = #tpu.dot_dimension_numbers<[1], [0], [0], [1], [0, 0, 1, 1], [], []>} : vector<19x96xf32>, vector<96x80xf32>, vector<19x80xf32> -> vector<19x80xf32>
    %c0_8 = arith.constant 0 : index
    %c0_9 = arith.constant 0 : index
    %8 = vector.load %arg5[%c0_8, %c0_9] : memref<1x80xf32, #tpu.memory_space<vmem>>, vector<1x80xf32>
    %9 = vector.broadcast %8 : vector<1x80xf32> to vector<19x80xf32>
    %10 = arith.addf %7, %9 : vector<19x80xf32>
    %11 = arith.negf %10 : vector<19x80xf32>
    %12 = math.exp %11 : vector<19x80xf32>
    %cst_10 = arith.constant 1.000000e+00 : f32
    %13 = vector.broadcast %cst_10 : f32 to vector<19x80xf32>
    %14 = arith.addf %13, %12 : vector<19x80xf32>
    %15 = arith.divf %13, %14 : vector<19x80xf32>
    %c0_11 = arith.constant 0 : index
    %c0_12 = arith.constant 0 : index
    %16 = vector.load %arg6[%c0_11, %c0_12] : memref<80x16xf32, #tpu.memory_space<vmem>>, vector<80x16xf32>
    %cst_13 = arith.constant dense<0.000000e+00> : vector<19x16xf32>
    %17 = tpu.matmul %15, %16, %cst_13 {dimension_numbers = #tpu.dot_dimension_numbers<[1], [0], [0], [1], [0, 0, 1, 1], [], []>} : vector<19x80xf32>, vector<80x16xf32>, vector<19x16xf32> -> vector<19x16xf32>
    %c0_14 = arith.constant 0 : index
    %c0_15 = arith.constant 0 : index
    %18 = vector.load %arg7[%c0_14, %c0_15] : memref<1x16xf32, #tpu.memory_space<vmem>>, vector<1x16xf32>
    %19 = vector.broadcast %18 : vector<1x16xf32> to vector<19x16xf32>
    %20 = arith.addf %17, %19 : vector<19x16xf32>
    %cst_16 = arith.constant 0.000000e+00 : f32
    %21 = vector.broadcast %cst_16 : f32 to vector<19x16xf32>
    %22 = arith.maximumf %20, %21 : vector<19x16xf32>
    %c0_17 = arith.constant 0 : index
    %c0_18 = arith.constant 0 : index
    %23 = vector.load %arg8[%c0_17, %c0_18] : memref<19x16xf32, #tpu.memory_space<vmem>>, vector<19x16xf32>
    tpu.vector_store %arg8[%c0_17, %c0_18], %22 {strides = array<i32>} : memref<19x16xf32, #tpu.memory_space<vmem>>, vector<19x16xf32>,
    return
  }
  func.func @transform_0(%arg0: i32) -> (i32, i32) {
    %c0_i32 = arith.constant 0 : i32
    %c0_i32_0 = arith.constant 0 : i32
    return %arg0, %c0_i32 : i32, i32
  }
  func.func @transform_1(%arg0: i32) -> (i32, i32) {
    %c0_i32 = arith.constant 0 : i32
    %c0_i32_0 = arith.constant 0 : i32
    %c0_i32_1 = arith.constant 0 : i32
    return %c0_i32, %c0_i32_0 : i32, i32
  }
  func.func @transform_2(%arg0: i32) -> (i32, i32) {
    %c0_i32 = arith.constant 0 : i32
    %c0_i32_0 = arith.constant 0 : i32
    %c0_i32_1 = arith.constant 0 : i32
    return %c0_i32, %c0_i32_0 : i32, i32
  }
  func.func @transform_3(%arg0: i32) -> (i32, i32) {
    %c0_i32 = arith.constant 0 : i32
    %c0_i32_0 = arith.constant 0 : i32
    %c0_i32_1 = arith.constant 0 : i32
    return %c0_i32, %c0_i32_0 : i32, i32
  }
  func.func @transform_4(%arg0: i32) -> (i32, i32) {
    %c0_i32 = arith.constant 0 : i32
    %c0_i32_0 = arith.constant 0 : i32
    %c0_i32_1 = arith.constant 0 : i32
    return %c0_i32, %c0_i32_0 : i32, i32
  }
  func.func @transform_5(%arg0: i32) -> (i32, i32) {
    %c0_i32 = arith.constant 0 : i32
    %c0_i32_0 = arith.constant 0 : i32
    %c0_i32_1 = arith.constant 0 : i32
    return %c0_i32, %c0_i32_0 : i32, i32
  }
  func.func @transform_6(%arg0: i32) -> (i32, i32) {
    %c0_i32 = arith.constant 0 : i32
    %c0_i32_0 = arith.constant 0 : i32
    %c0_i32_1 = arith.constant 0 : i32
    return %c0_i32, %c0_i32_0 : i32, i32
  }
  func.func @transform_7(%arg0: i32) -> (i32, i32) {
    %c0_i32 = arith.constant 0 : i32
    %c0_i32_0 = arith.constant 0 : i32
    return %arg0, %c0_i32 : i32, i32
  }
}

</mosaic_0001>

<bundles_post_ra>
// kernel: widedeep_forward.1
= control target key start
LH: loop header
LB: loop body
LE: loop exit
PB: predicated region body
PF: predicated region fallthrough
CT: control target
= control target key end

     0   :  { %vm91_vm0 = vcmask 785408   ;;  %vm198_vm4 = vcmask 654336   ;;  %vm237_vm14 = vcmask 130048   ;;  %vm240_vm15 = vcmask 124928   ;;  %s470_s1 = inlined_call_operand.vmem [shape: f32[128,96], index: 1, kind: input, shape index: {}]   ;;  %s471_s3 = inlined_call_operand.vmem [shape: f32[96,80], index: 3, kind: input, shape index: {}]   ;;  %s472_s2 = inlined_call_operand.vmem [shape: f32[1,96], index: 2, kind: input, shape index: {}]   ;;  %s473_s0 = inlined_call_operand.vmem [shape: f32[19,128], index: 0, kind: input, shape index: {}]   ;;  %s474_s4 = inlined_call_operand.vmem [shape: f32[1,80], index: 4, kind: input, shape index: {}]   ;;  %s475_s6 = inlined_call_operand.vmem [shape: f32[1,16], index: 6, kind: input, shape index: {}]   ;;  %s476_s5 = inlined_call_operand.vmem [shape: f32[80,16], index: 5, kind: input, shape index: {}]   ;;  %s477_s7 = inlined_call_operand.vmem [shape: f32[19,16], index: 7, kind: output, shape index: {}]  }
   0x1   :  { %v44_v0 = vld [vmem:[%s470_s1 + $0x78] sm:$0xff]  ;;  %v43_v1 = vld [vmem:[%s470_s1 + $0x70] sm:$0xff]  ;;  %v42_v2 = vld [vmem:[%s470_s1 + $0x68] sm:$0xff] }
   0x2   :  { %49 = vmatpush.msra.mxu0 %v44_v0  ;;  %255 = vmatpush.msra.mxu3 %v44_v0  ;;  %v41_v3 = vld [vmem:[%s470_s1 + $0x60] sm:$0xff]  ;;  %v40_v4 = vld [vmem:[%s470_s1 + $0x58] sm:$0xff]  ;;  %v39_v5 = vld [vmem:[%s470_s1 + $0x50] sm:$0xff] }
   0x3   :  { %v86_v6 = vld [vmem:[%s471_s3 + $0x58] sm:$0xff]  ;;  %v85_v7 = vld [vmem:[%s471_s3 + $0x50] sm:$0xff]  ;;  %v38_v8 = vld [vmem:[%s470_s1 + $0x48] sm:$0xff] }
   0x4   :  { %50 = vmatpush.msra.mxu0 %v43_v1  ;;  %256 = vmatpush.msra.mxu3 %v43_v1  ;;  %v84_v9 = vld [vmem:[%s471_s3 + $0x48] sm:$0xff]  ;;  %v37_v10 = vld [vmem:[%s470_s1 + $0x40] sm:$0xff]  ;;  %v36_v12 = vld [vmem:[%s470_s1 + $0x38] sm:$0xff] }
   0x5   :  { %105 = vmatpush.msra.mxu1 %v86_v6  ;;  %v83_v11 = vld [vmem:[%s471_s3 + $0x40] sm:$0xff]  ;;  %v82_v13 = vld [vmem:[%s471_s3 + $0x38] sm:$0xff]  ;;  %v35_v14 = vld [vmem:[%s470_s1 + $0x30] sm:$0xff] }
   0x6   :  { %51 = vmatpush.msra.mxu0 %v42_v2  ;;  %257 = vmatpush.msra.mxu3 %v42_v2  ;;  %v81_v15 = vld [vmem:[%s471_s3 + $0x30] sm:$0xff]  ;;  %v34_v16 = vld [vmem:[%s470_s1 + $0x28] sm:$0xff]  ;;  %v33_v18 = vld [vmem:[%s470_s1 + $0x20] sm:$0xff] }
   0x7   :  { %106 = vmatpush.msra.mxu1 %v85_v7  ;;  %v80_v17 = vld [vmem:[%s471_s3 + $0x28] sm:$0xff]  ;;  %v79_v19 = vld [vmem:[%s471_s3 + $0x20] sm:$0xff]  ;;  %v32_v20 = vld [vmem:[%s470_s1 + $0x18] sm:$0xff] }
   0x8   :  { %52 = vmatpush.msra.mxu0 %v41_v3  ;;  %258 = vmatpush.msra.mxu3 %v41_v3  ;;  %v78_v21 = vld [vmem:[%s471_s3 + $0x18] sm:$0xff]  ;;  %v31_v22 = vld [vmem:[%s470_s1 + $0x10] sm:$0xff]  ;;  %v30_v24 = vld [vmem:[%s470_s1 + $0x8] sm:$0xff] }
   0x9   :  { %107 = vmatpush.msra.mxu1 %v84_v9  ;;  %v77_v23 = vld [vmem:[%s471_s3 + $0x10] sm:$0xff]  ;;  %v29_v25 = vld [vmem:[%s470_s1] sm:$0xff]  ;;  %v27_v27 = vld [vmem:[%s473_s0 + $0x8] sm:$0xff] }
   0xa   :  { %53 = vmatpush.msra.mxu0 %v40_v4  ;;  %259 = vmatpush.msra.mxu3 %v40_v4  ;;  %v26_v26 = vld [vmem:[%s473_s0] sm:$0xff]  ;;  %v28_v28 = vld [vmem:[%s473_s0 + $0x10] sm:$0x7]  ;;  %v76_v29 = vld [vmem:[%s471_s3 + $0x8] sm:$0xff] }
   0xb   :  { %108 = vmatpush.msra.mxu1 %v83_v11  ;;  %v75_v30 = vld [vmem:[%s471_s3] sm:$0xff]  ;;  %v193_v38 = vld [vmem:[%s476_s5 + $0x48] sm:$0xff]  ;;  %v191_v40 = vld [vmem:[%s476_s5 + $0x38] sm:$0xff] }
   0xc   :  { %54 = vmatpush.msra.mxu0 %v39_v5  ;;  %260 = vmatpush.msra.mxu3 %v39_v5  ;;  %v271_v31 = vld [vmem:[%s472_s2] ss:$0 sm:$0xff]  ;;  %v190_v41 = vld [vmem:[%s476_s5 + $0x30] sm:$0xff]  ;;  %v189_v42 = vld [vmem:[%s476_s5 + $0x28] sm:$0xff] }
   0xd   :  { %109 = vmatpush.msra.mxu1 %v82_v13  ;;  %214 = vmatpush.msra.mxu2 %v193_v38  ;;  %v192_v39 = vld [vmem:[%s476_s5 + $0x40] sm:$0xff]  ;;  %v187_v44 = vld [vmem:[%s476_s5 + $0x18] sm:$0xff]  ;;  %v186_v45 = vld [vmem:[%s476_s5 + $0x10] sm:$0xff] }
   0xe   :  { %55 = vmatpush.msra.mxu0 %v38_v8  ;;  %261 = vmatpush.msra.mxu3 %v38_v8  ;;  %v188_v43 = vld [vmem:[%s476_s5 + $0x20] sm:$0xff]  ;;  %v185_v46 = vld [vmem:[%s476_s5 + $0x8] sm:$0xff] }
   0xf   :  { %110 = vmatpush.msra.mxu1 %v81_v15  ;;  %215 = vmatpush.msra.mxu2 %v192_v39  ;;  %v272_v47 = vld [vmem:[%s474_s4] ss:$0 sm:$0xff] }
  0x10   :  { %56 = vmatpush.msra.mxu0 %v37_v10  ;;  %262 = vmatpush.msra.mxu3 %v37_v10  ;;  %v184_v48 = vld [vmem:[%s476_s5] sm:$0xff] }
  0x11   :  { %111 = vmatpush.msra.mxu1 %v80_v17  ;;  %216 = vmatpush.msra.mxu2 %v191_v40 }
  0x12   :  { %57 = vmatpush.msra.mxu0 %v36_v12  ;;  %263 = vmatpush.msra.mxu3 %v36_v12 }
  0x13   :  { %112 = vmatpush.msra.mxu1 %v79_v19  ;;  %217 = vmatpush.msra.mxu2 %v190_v41 }
  0x14   :  { %58 = vmatpush.msra.mxu0 %v35_v14  ;;  %264 = vmatpush.msra.mxu3 %v35_v14 }
  0x15   :  { %113 = vmatpush.msra.mxu1 %v78_v21  ;;  %218 = vmatpush.msra.mxu2 %v189_v42 }
  0x16   :  { %59 = vmatpush.msra.mxu0 %v34_v16  ;;  %265 = vmatpush.msra.mxu3 %v34_v16 }
  0x17   :  { %114 = vmatpush.msra.mxu1 %v77_v23  ;;  %219 = vmatpush.msra.mxu2 %v188_v43 }
  0x18   :  { %60 = vmatpush.msra.mxu0 %v33_v18  ;;  %266 = vmatpush.msra.mxu3 %v33_v18 }
  0x19   :  { %115 = vmatpush.msra.mxu1 %v76_v29  ;;  %220 = vmatpush.msra.mxu2 %v187_v44 }
  0x1a   :  { %61 = vmatpush.msra.mxu0 %v32_v20  ;;  %267 = vmatpush.msra.mxu3 %v32_v20 }
  0x1b   :  { %116 = vmatpush.msra.mxu1 %v75_v30  ;;  %221 = vmatpush.msra.mxu2 %v186_v45  ;;  %v273_v30 = vld [vmem:[%s475_s6] ss:$0 sm:$0xff] }
  0x1c   :  { %62 = vmatpush.msra.mxu0 %v31_v22  ;;  %268 = vmatpush.msra.mxu3 %v31_v22 }
  0x1d   :  { %222 = vmatpush.msra.mxu2 %v185_v46 }
  0x1e   :  { %63 = vmatpush.msra.mxu0 %v30_v24  ;;  %269 = vmatpush.msra.mxu3 %v30_v24 }
  0x1f   :  { %223 = vmatpush.msra.mxu2 %v184_v48 }
  0x20   :  { %64 = vmatpush.msra.mxu0 %v29_v25  ;;  %270 = vmatpush.msra.mxu3 %v29_v25 }
  0x21   :  { %65 = vmatmul.f32.vlgmr.msra.gmra.mxu0 %v26_v26  ;;  %68 = vmatmul.f32.vlgmr.msra.gmra.mxu3 %v27_v27 }
  0x29   :  { %71 = vmatmul.f32.gmra.mxu3 %v28_v28 }
  0x9e   :  { %v66_v32 = vpop.f32.mrf.mxu0 }
  0x9f   :  { %v67_v33 = vadd.f32 %v271_v31, %v66_v32 }
  0xa1   :  { %246 = vmatmul.msk.f32.vlgmr.msra.gmra.mxu1 %vm91_vm0, %v67_v33 }
  0xa4   :  { %v69_v34 = vpop.f32.mrf.mxu3 }
  0xa5   :  { %v70_v35 = vadd.f32 %v271_v31, %v69_v34 }
  0xa9   :  { %247 = vmatmul.msk.f32.gmra.mxu1 %vm91_vm0, %v70_v35 }
  0xac   :  { %v72_v36 = vpop.f32.mrf.mxu3 }
  0xad   :  { %v73_v37 = vadd.f32 %v271_v31, %v72_v36 }
  0xb1   :  { %248 = vmatmul.msk.f32.gmra.mxu1 %vm91_vm0, %v73_v37 }
 0x11e   :  { %v118_v49 = vpop.f32.mrf.mxu1 }
 0x11f   :  { %v119_v50 = vadd.f32 %v272_v47, %v118_v49 }
 0x121   :  { %v249_v51 = vmul.f32 -1.442695, %v119_v50 }
 0x123   :  { %274 = vpow2.f32 %v249_v51 }
 0x126   :  { %v121_v52 = vpop.f32.mrf.mxu1 }
 0x127   :  { %v122_v53 = vadd.f32 %v272_v47, %v121_v52 }
 0x129   :  { %v275_v54 = vpop.eup %274  ;;  %v250_v55 = vmul.f32 -1.442695, %v122_v53 }
 0x12a   :  { %v136_v56 = vadd.f32 1.0, %v275_v54 }
 0x12b   :  { %276 = vpow2.f32 %v250_v55 }
 0x12c   :  { %278 = vrcp.f32 %v136_v56  ;;  %v150_v1 = vand.u32 2147483648, %v136_v56  ;;  %v148_v3 = vand.u32 2147483647, %v136_v56  ;;  %vm144_vm2 = vweird.f32 %v136_v56 }
 0x12e   :  { %v124_v57 = vpop.f32.mrf.mxu1  ;;  %v151_v8 = vor.u32 1.1754944e-38, %v150_v1  ;;  %vm149_vm5 = vcmp.eq.f32.partialorder %v148_v3, 8.507059e+37 }
 0x12f   :  { %v125_v58 = vadd.f32 %v272_v47, %v124_v57 }
 0x131   :  { %v277_v59 = vpop.eup %276  ;;  %v251_v60 = vmul.f32 -1.442695, %v125_v58 }
 0x132   :  { %v279_v61 = vpop.eup %278  ;;  %v137_v62 = vadd.f32 1.0, %v277_v59 }
 0x133   :  { %280 = vpow2.f32 %v251_v60  ;;  %v140_v63 = vmul.f32 %v279_v61, %v136_v56  ;;  %vm145_vm1 = vweird.f32 %v279_v61 }
 0x134   :  { %282 = vrcp.f32 %v137_v62  ;;  %vm146_vm3 = vmor %vm144_vm2, %vm145_vm1  ;;  %v165_v13 = vand.u32 2147483648, %v137_v62  ;;  %v163_v15 = vand.u32 2147483647, %v137_v62  ;;  %vm159_vm7 = vweird.f32 %v137_v62 }
 0x135   :  { %v141_v0 = vsub.f32 1.0, %v140_v63 }
 0x136   :  { %v166_v18 = vor.u32 1.1754944e-38, %v165_v13  ;;  %vm164_vm9 = vcmp.eq.f32.partialorder %v163_v15, 8.507059e+37 }
 0x137   :  { %v142_v2 = vmul.f32 %v279_v61, %v141_v0 }
 0x139   :  { %v281_v4 = vpop.eup %280  ;;  %v143_v5 = vadd.f32 %v279_v61, %v142_v2 }
 0x13a   :  { %v283_v6 = vpop.eup %282  ;;  %v138_v7 = vadd.f32 1.0, %v281_v4 }
 0x13b   :  { %v147_v9 = vsel %vm146_vm3, %v279_v61, %v143_v5  ;;  %v155_v10 = vmul.f32 %v283_v6, %v137_v62  ;;  %vm160_vm6 = vweird.f32 %v283_v6 }
 0x13c   :  { %284 = vrcp.f32 %v138_v7  ;;  %v152_v11 = vsel %vm149_vm5, %v151_v8, %v147_v9  ;;  %vm161_vm8 = vmor %vm159_vm7, %vm160_vm6  ;;  %v180_v23 = vand.u32 2147483648, %v138_v7  ;;  %v178_v25 = vand.u32 2147483647, %v138_v7 }
 0x13d   :  { %252 = vmatmul.msk.f32.vlgmr.msra.gmra.mxu2 %vm198_vm4, %v152_v11  ;;  %v156_v12 = vsub.f32 1.0, %v155_v10  ;;  %vm174_vm11 = vweird.f32 %v138_v7 }
 0x13e   :  { %v181_v27 = vor.u32 1.1754944e-38, %v180_v23  ;;  %vm179_vm13 = vcmp.eq.f32.partialorder %v178_v25, 8.507059e+37 }
 0x13f   :  { %v157_v14 = vmul.f32 %v283_v6, %v156_v12 }
 0x141   :  { %v158_v16 = vadd.f32 %v283_v6, %v157_v14 }
 0x142   :  { %v285_v17 = vpop.eup %284 }
 0x143   :  { %v162_v19 = vsel %vm161_vm8, %v283_v6, %v158_v16  ;;  %v170_v20 = vmul.f32 %v285_v17, %v138_v7  ;;  %vm175_vm10 = vweird.f32 %v285_v17 }
 0x144   :  { %v167_v21 = vsel %vm164_vm9, %v166_v18, %v162_v19  ;;  %vm176_vm12 = vmor %vm174_vm11, %vm175_vm10 }
 0x145   :  { %253 = vmatmul.msk.f32.gmra.mxu2 %vm198_vm4, %v167_v21  ;;  %v171_v22 = vsub.f32 1.0, %v170_v20 }
 0x147   :  { %v172_v24 = vmul.f32 %v285_v17, %v171_v22 }
 0x149   :  { %v173_v26 = vadd.f32 %v285_v17, %v172_v24 }
 0x14b   :  { %v177_v28 = vsel %vm176_vm12, %v285_v17, %v173_v26 }
 0x14c   :  { %v182_v29 = vsel %vm179_vm13, %v181_v27, %v177_v28 }
 0x14d   :  { %254 = vmatmul.msk.f32.gmra.mxu2 %vm198_vm4, %v182_v29 }
 0x1c0   :  { %v225_v31 = vpop.f32.mrf.mxu2 }
 0x1c1   :  { %v226_v32 = vadd.f32 %v273_v30, %v225_v31 }
 0x1c3   :  { %v234_v33 = vmax.f32 %v226_v32, 0.0 }
 0x1c5   :  { %238 = vst.msk [vmem:[%s477_s7] sm:$0xff] %vm237_vm14, %v234_v33 }
 0x1c8   :  { %v228_v34 = vpop.f32.mrf.mxu2 }
 0x1c9   :  { %v229_v35 = vadd.f32 %v273_v30, %v228_v34 }
 0x1cb   :  { %v235_v36 = vmax.f32 %v229_v35, 0.0 }
 0x1cd   :  { %239 = vst.msk [vmem:[%s477_s7 + $0x8] sm:$0xff] %vm237_vm14, %v235_v36 }
 0x1d0   :  { %v231_v37 = vpop.f32.mrf.mxu2 }
 0x1d1   :  { %v232_v38 = vadd.f32 %v273_v30, %v231_v37 }
 0x1d3   :  { %v236_v39 = vmax.f32 %v232_v38, 0.0 }
 0x1d5   :  { %241 = vst.msk [vmem:[%s477_s7 + $0x10] sm:$0x7] %vm240_vm15, %v236_v39 }

</bundles_post_ra>
